<compile_context>
chip_gen: v6e
topology: v6e:2x2x1
jax: 0.10.0
libtpu: 0.0.40
codegen_flags: <defaults>
</compile_context>

<pallas_src>
import math
from functools import partial

import jax
import jax.numpy as jnp
from jax.experimental import pallas as pl
from jax.experimental.pallas import tpu as pltpu


# ----------------------------- helpers --------------------------------------

def _round_up(x, m):
    return (x + m - 1) // m * m


def _largest_tile(total, candidates):
    for t in candidates:
        if total % t == 0:
            return t
    return candidates[-1]


def _pick_row_tile(R):
    """Pick TR so that (a) TR divides R (row slice after the kernel is a free
    view) and (b) there are >= 2 row tiles (both v7x TensorCores get work)."""
    for t in (1024, 512, 256, 128, 64, 32, 16):
        if R % t == 0 and R // t >= 2:
            return t, R
    # Tiny / awkward R: one padded tile; multiple of 16 keeps bf16 stores
    # unmasked at sublane-packing granularity.
    r_pad = _round_up(R, 16)
    return r_pad, r_pad


_VMEM_LIMIT = 32 * 1024 * 1024          # safe on v5e/v6e/v7x; tiles are small
_COLLAPSE_WEIGHT_BYTES = 4 * 1024 * 1024   # whole (K_pad, Co_pad) bf16 weight
_COLLAPSE_PATCH_BYTES = 4 * 1024 * 1024    # one (TR, K_pad) bf16 patch block


# ----------------------------- activation epilogues --------------------------

def _apply_act(y, activation):
    if activation == "leaky_relu":
        return jnp.maximum(y, 0.2 * y)
    if activation == "sigmoid":
        # reciprocal on the EUP slot; clamp keeps the approx result in [0, 1].
        s = pl.reciprocal(1.0 + jnp.exp(-y), approx=True)
        return jnp.clip(s, 0.0, 1.0)
    return y


# ----------------------------- Pallas kernels -------------------------------

def _mm_full_bias_act_kernel(p_ref, w_ref, b_ref, o_ref, *, activation):
    """Single-shot matmul (full K, full Co) + bias + activation."""
    y = jnp.dot(p_ref[...], w_ref[...], preferred_element_type=jnp.float32)
    y = y + b_ref[...]
    o_ref[...] = _apply_act(y, activation).astype(o_ref.dtype)


def _mm_full_bn_kernel(p_ref, w_ref, y_ref, s_ref, ss_ref):
    """Single-shot matmul; emits bf16 y plus per-row-tile column sum / sumsq
    computed from the f32 result (so bf16 rounding never touches the stats)."""
    acc = jnp.dot(p_ref[...], w_ref[...], preferred_element_type=jnp.float32)
    y_ref[...] = acc.astype(y_ref.dtype)
    co = acc.shape[1]
    s_ref[...] = jnp.sum(acc, axis=0, keepdims=True).reshape(1, 1, co)
    ss_ref[...] = jnp.sum(acc * acc, axis=0, keepdims=True).reshape(1, 1, co)


def _mm_tiled_bias_act_kernel(p_ref, w_ref, b_ref, o_ref, acc_ref, *,
                              activation):
    """Tiled matmul with f32 accumulator; bias + activation fused at last k."""
    k = pl.program_id(2)

    @pl.when(k == 0)
    def _():
        acc_ref[...] = jnp.zeros_like(acc_ref)

    acc_ref[...] += jnp.dot(p_ref[...], w_ref[...],
                            preferred_element_type=jnp.float32)

    @pl.when(k == pl.num_programs(2) - 1)
    def _():
        y = acc_ref[...] + b_ref[...]
        o_ref[...] = _apply_act(y, activation).astype(o_ref.dtype)


def _mm_tiled_bn_kernel(p_ref, w_ref, y_ref, s_ref, ss_ref, acc_ref):
    """Tiled matmul; at the last k emits bf16 y plus per-tile stat partials."""
    k = pl.program_id(2)

    @pl.when(k == 0)
    def _():
        acc_ref[...] = jnp.zeros_like(acc_ref)

    acc_ref[...] += jnp.dot(p_ref[...], w_ref[...],
                            preferred_element_type=jnp.float32)

    @pl.when(k == pl.num_programs(2) - 1)
    def _():
        acc = acc_ref[...]
        y_ref[...] = acc.astype(y_ref.dtype)
        tc = acc.shape[1]
        s_ref[...] = jnp.sum(acc, axis=0, keepdims=True).reshape(1, 1, tc)
        ss_ref[...] = jnp.sum(acc * acc, axis=0, keepdims=True).reshape(1, 1, tc)


def _bn_act_kernel(y_ref, scale_ref, shift_ref, o_ref):
    """Apply precomputed batch-norm affine (scale/shift) + LeakyReLU(0.2)."""
    y = y_ref[...].astype(jnp.float32) * scale_ref[...] + shift_ref[...]
    o_ref[...] = jnp.maximum(y, 0.2 * y).astype(o_ref.dtype)


# ----------------------------- Pallas wrappers ------------------------------

def pallas_conv_matmul(patches, w_mat, bias, *, activation, bn, TR, out_dtype):
    """patches (R_pad, K_pad) bf16 @ w_mat (K_pad, Co_pad) bf16.

    bn=False: returns (R_pad, Co_pad) with bias + activation fused.
    bn=True : returns (y bf16, sum (R_tiles,1,Co_pad) f32, sumsq (...) f32).
    """
    R_pad, K_pad = patches.shape
    Co_pad = w_mat.shape[1]
    R_tiles = R_pad // TR

    collapse = (K_pad * Co_pad * 2 <= _COLLAPSE_WEIGHT_BYTES
                and TR * K_pad * 2 <= _COLLAPSE_PATCH_BYTES)

    if bn:
        out_shape = (jax.ShapeDtypeStruct((R_pad, Co_pad), jnp.bfloat16),
                     jax.ShapeDtypeStruct((R_tiles, 1, Co_pad), jnp.float32),
                     jax.ShapeDtypeStruct((R_tiles, 1, Co_pad), jnp.float32))
    else:
        out_shape = jax.ShapeDtypeStruct((R_pad, Co_pad), out_dtype)

    args = [patches, w_mat]

    if collapse:
        grid = (R_tiles,)
        in_specs = [pl.BlockSpec((TR, K_pad), lambda r: (r, 0)),
                    pl.BlockSpec((K_pad, Co_pad), lambda r: (0, 0))]
        if bn:
            kern = _mm_full_bn_kernel
            out_specs = (pl.BlockSpec((TR, Co_pad), lambda r: (r, 0)),
                         pl.BlockSpec((1, 1, Co_pad), lambda r: (r, 0, 0)),
                         pl.BlockSpec((1, 1, Co_pad), lambda r: (r, 0, 0)))
        else:
            in_specs.append(pl.BlockSpec((1, Co_pad), lambda r: (0, 0)))
            args.append(bias)
            kern = partial(_mm_full_bias_act_kernel, activation=activation)
            out_specs = pl.BlockSpec((TR, Co_pad), lambda r: (r, 0))
        scratch = []
        dims = ("parallel",)
    else:
        TK = _largest_tile(K_pad, (512, 256, 128))
        TC = _largest_tile(Co_pad, (256, 128))
        grid = (R_tiles, Co_pad // TC, K_pad // TK)
        in_specs = [pl.BlockSpec((TR, TK), lambda r, c, k: (r, k)),
                    pl.BlockSpec((TK, TC), lambda r, c, k: (k, c))]
        if bn:
            kern = _mm_tiled_bn_kernel
            out_specs = (pl.BlockSpec((TR, TC), lambda r, c, k: (r, c)),
                         pl.BlockSpec((1, 1, TC), lambda r, c, k: (r, 0, c)),
                         pl.BlockSpec((1, 1, TC), lambda r, c, k: (r, 0, c)))
        else:
            in_specs.append(pl.BlockSpec((1, TC), lambda r, c, k: (0, c)))
            args.append(bias)
            kern = partial(_mm_tiled_bias_act_kernel, activation=activation)
            out_specs = pl.BlockSpec((TR, TC), lambda r, c, k: (r, c))
        scratch = [pltpu.VMEM((TR, TC), jnp.float32)]
        dims = ("parallel", "parallel", "arbitrary")

    return pl.pallas_call(
        kern,
        out_shape=out_shape,
        grid_spec=pltpu.PrefetchScalarGridSpec(
            num_scalar_prefetch=0,
            grid=grid,
            in_specs=in_specs,
            out_specs=out_specs,
            scratch_shapes=scratch,
        ),
        compiler_params=pltpu.CompilerParams(
            dimension_semantics=dims,
            vmem_limit_bytes=_VMEM_LIMIT),
    )(*args)


def pallas_bn_act(y, scale, shift, *, TR, out_dtype):
    """Tiled elementwise normalize + LeakyReLU over (R_pad, Co_pad) bf16 y."""
    R_pad, Co_pad = y.shape
    TC = _largest_tile(Co_pad, (512, 256, 128))
    grid = (R_pad // TR, Co_pad // TC)
    return pl.pallas_call(
        _bn_act_kernel,
        out_shape=jax.ShapeDtypeStruct((R_pad, Co_pad), out_dtype),
        grid_spec=pltpu.PrefetchScalarGridSpec(
            num_scalar_prefetch=0,
            grid=grid,
            in_specs=[pl.BlockSpec((TR, TC), lambda r, c: (r, c)),
                      pl.BlockSpec((1, TC), lambda r, c: (0, c)),
                      pl.BlockSpec((1, TC), lambda r, c: (0, c))],
            out_specs=pl.BlockSpec((TR, TC), lambda r, c: (r, c)),
        ),
        compiler_params=pltpu.CompilerParams(
            dimension_semantics=("parallel", "parallel"),
            vmem_limit_bytes=_VMEM_LIMIT),
    )(y, scale, shift)


# ------------------------------- JAX glue ------------------------------------

def im2col_nhwc(x, k, stride, pad):
    """x: (N, H, W, C) -> patches (N*Ho*Wo, k*k*C), feature order (kh, kw, c)."""
    N, H, W, C = x.shape
    xp = jnp.pad(x, ((0, 0), (pad, pad), (pad, pad), (0, 0)))
    Ho = (H + 2 * pad - k) // stride + 1
    Wo = (W + 2 * pad - k) // stride + 1
    taps = []
    for i in range(k):
        for j in range(k):
            taps.append(
                xp[:, i:i + stride * (Ho - 1) + 1:stride,
                      j:j + stride * (Wo - 1) + 1:stride, :])  # (N, Ho, Wo, C)
    p = jnp.stack(taps, axis=3)                  # (N, Ho, Wo, k*k, C)
    p = p.reshape(N * Ho * Wo, k * k * C)        # feature order (kh, kw, c)
    return p, Ho, Wo


def _conv_layer_forward(x_nhwc, cfg, prm):
    """One ConvBlock: conv (Pallas matmul) [+ batch-norm] + activation."""
    N = x_nhwc.shape[0]
    patches, Ho, Wo = im2col_nhwc(x_nhwc.astype(jnp.bfloat16),
                                  cfg["k"], cfg["s"], cfg["p"])
    R, K = patches.shape
    Co, K_pad, Co_pad = cfg["cout"], cfg["K_pad"], cfg["Co_pad"]

    TR, R_pad = _pick_row_tile(R)
    pad_r, pad_k = R_pad - R, K_pad - K
    if pad_r or pad_k:
        patches = jnp.pad(patches, ((0, pad_r), (0, pad_k)))

    if cfg["bn"]:
        # Conv-as-matmul; bias dropped (cancelled exactly by mean subtraction).
        # The kernel emits bf16 y plus per-row-tile f32 sum / sumsq partials
        # (padded rows/cols are exact zeros -> summing the padded array and
        # dividing by the true R is exact).
        y, s_part, ss_part = pallas_conv_matmul(
            patches, prm["w"], None, activation=None, bn=True,
            TR=TR, out_dtype=jnp.bfloat16)
        total = jnp.sum(s_part, axis=0)          # (1, Co_pad)
        total_sq = jnp.sum(ss_part, axis=0)      # (1, Co_pad)
        mean = total / R
        # E[x^2]-E[x]^2 in f32; clamped at 0 (cancellation can only matter when
        # |mean| >> std, which does not occur with these weight magnitudes).
        var = jnp.maximum(total_sq / R - mean * mean, 0.0)
        scale = prm["gamma"] * jax.lax.rsqrt(var + 1e-5)
        shift = prm["beta"] - mean * scale
        out = pallas_bn_act(y, scale.astype(jnp.float32),
                            shift.astype(jnp.float32),
                            TR=TR, out_dtype=jnp.bfloat16)
    else:
        out_dtype = jnp.float32 if cfg["act"] == "sigmoid" else jnp.bfloat16
        out = pallas_conv_matmul(patches, prm["w"], prm["b"],
                                 activation=cfg["act"], bn=False,
                                 TR=TR, out_dtype=out_dtype)

    # Row slice is a free view when R_pad == R (the common case by
    # construction); the channel slice fuses into the next layer's im2col.
    return out[:R, :Co].reshape(N, Ho, Wo, Co)


# ------------------------------- model ---------------------------------------

class DCGANDiscriminatorPallas:
    """Mirrors DCGANDiscriminator(args) with args = (resolution, nc, ngf).

    BatchNorm uses batch statistics (PyTorch train-mode semantics)."""

    def __init__(self, key, resolution, nc, ngf):
        depth = int(math.log2(resolution)) - 1

        layer_defs = [dict(cin=nc, cout=ngf, k=4, s=2, p=1,
                           act="leaky_relu", bn=False)]
        mult = 1
        for _ in range(depth - 2):
            layer_defs.append(dict(cin=ngf * mult, cout=ngf * mult * 2, k=4,
                                   s=2, p=1, act="leaky_relu", bn=True))
            mult *= 2
        layer_defs.append(dict(cin=ngf * mult, cout=1, k=4, s=1, p=0,
                               act="sigmoid", bn=False))

        self.configs = []
        self.params = []
        keys = jax.random.split(key, len(layer_defs) * 3)
        for li, cfg in enumerate(layer_defs):
            kw, kb, kg = keys[3 * li], keys[3 * li + 1], keys[3 * li + 2]
            cin, cout, k = cfg["cin"], cfg["cout"], cfg["k"]
            K = cin * k * k
            K_pad = _round_up(K, 128)
            Co_pad = _round_up(cout, 128)

            # weights_init: conv weight ~ N(0, 0.02)
            w = 0.02 * jax.random.normal(kw, (cout, cin, k, k), jnp.float32)
            # Flatten to (kh, kw, cin, cout) -> (K, Co), pad lane-dense, bf16.
            w_mat = jnp.transpose(w, (2, 3, 1, 0)).reshape(K, cout)
            w_mat = jnp.pad(w_mat, ((0, K_pad - K), (0, Co_pad - cout)))
            prm = {"w": w_mat.astype(jnp.bfloat16)}

            if cfg["bn"]:
                # Conv bias omitted: cancelled exactly by the BN mean subtraction.
                # weights_init: BN weight ~ N(1, 0.02), bias = 0
                gamma = 1.0 + 0.02 * jax.random.normal(kg, (cout,), jnp.float32)
                prm["gamma"] = jnp.pad(gamma, (0, Co_pad - cout)).reshape(1, Co_pad)
                prm["beta"] = jnp.zeros((1, Co_pad), jnp.float32)
            else:
                # PyTorch default conv bias: U(-1/sqrt(fan_in), 1/sqrt(fan_in))
                bound = 1.0 / math.sqrt(cin * k * k)
                b = jax.random.uniform(kb, (cout,), jnp.float32, -bound, bound)
                prm["b"] = jnp.pad(b, (0, Co_pad - cout)).reshape(1, Co_pad)

            full_cfg = dict(cfg)
            full_cfg.update(K_pad=K_pad, Co_pad=Co_pad)
            self.configs.append(full_cfg)
            self.params.append(prm)

        self._jit_forward = jax.jit(self._forward)

    def _forward(self, params, x):
        # x: (N, C, H, W) NCHW float32 (PyTorch convention); go NHWC once.
        x = jnp.transpose(x, (0, 2, 3, 1))
        for cfg, prm in zip(self.configs, params):
            x = _conv_layer_forward(x, cfg, prm)
        # Back to NCHW for the (N, 1, 1, 1) output.
        return jnp.transpose(x, (0, 3, 1, 2)).astype(jnp.float32)

    def __call__(self, x):
        return self._jit_forward(self.params, x)


# --------------------------------- main ---------------------------------------

if __name__ == "__main__":
    key = jax.random.PRNGKey(0)
    k_params, k_input = jax.random.split(key)

    resolution, nc, ngf, batch = 16, 3, 8, 2
    model = DCGANDiscriminatorPallas(k_params, resolution, nc, ngf)

    x = jax.random.normal(k_input, (batch, nc, resolution, resolution),
                          jnp.float32)

    out = model(x)
    out = jax.block_until_ready(out)

    assert out.shape == (batch, 1, 1, 1), out.shape
    assert bool(jnp.all(jnp.isfinite(out)))
    assert bool(jnp.all((out >= 0.0) & (out <= 1.0)))  # sigmoid output
    print("KERNEL_OK")
</pallas_src>

<mosaic_0001>
module attributes {stable_mosaic.version = 11 : i64} {
  func.func @_mm_full_bias_act_kernel(%arg0: i32, %arg1: memref<64x128xbf16, #tpu.memory_space<vmem>>, %arg2: memref<128x128xbf16, #tpu.memory_space<vmem>>, %arg3: memref<1x128xf32, #tpu.memory_space<vmem>>, %arg4: memref<64x128xbf16, #tpu.memory_space<vmem>>) attributes {dimension_semantics = [#tpu.dimension_semantics<parallel>], iteration_bounds = array<i64: 2>, scalar_prefetch = 0 : i64, scratch_operands = 0 : i64, tpu.core_type = #tpu.core_type<tc>, window_params = [{transform_indices = @transform_0, window_bounds = array<i64: 64, 128>}, {pipeline_mode = #tpu.pipeline_mode<synchronous>, transform_indices = @transform_1, window_bounds = array<i64: 128, 128>}, {pipeline_mode = #tpu.pipeline_mode<synchronous>, transform_indices = @transform_2, window_bounds = array<i64: 1, 128>}, {transform_indices = @transform_3, window_bounds = array<i64: 64, 128>}]} {
    %c0 = arith.constant 0 : index
    %c0_0 = arith.constant 0 : index
    %0 = vector.load %arg1[%c0, %c0_0] : memref<64x128xbf16, #tpu.memory_space<vmem>>, vector<64x128xbf16>
    %c0_1 = arith.constant 0 : index
    %c0_2 = arith.constant 0 : index
    %1 = vector.load %arg2[%c0_1, %c0_2] : memref<128x128xbf16, #tpu.memory_space<vmem>>, vector<128x128xbf16>
    %cst = arith.constant dense<0.000000e+00> : vector<64x128xf32>
    %2 = tpu.matmul %0, %1, %cst {dimension_numbers = #tpu.dot_dimension_numbers<[1], [0], [0], [1], [0, 0, 1, 1], [], []>} : vector<64x128xbf16>, vector<128x128xbf16>, vector<64x128xf32> -> vector<64x128xf32>
    %c0_3 = arith.constant 0 : index
    %c0_4 = arith.constant 0 : index
    %3 = vector.load %arg3[%c0_3, %c0_4] : memref<1x128xf32, #tpu.memory_space<vmem>>, vector<1x128xf32>
    %4 = vector.broadcast %3 : vector<1x128xf32> to vector<64x128xf32>
    %5 = arith.addf %2, %4 : vector<64x128xf32>
    %cst_5 = arith.constant 2.000000e-01 : f32
    %6 = vector.broadcast %cst_5 : f32 to vector<64x128xf32>
    %7 = arith.mulf %6, %5 : vector<64x128xf32>
    %8 = arith.maximumf %5, %7 : vector<64x128xf32>
    %9 = arith.truncf %8 : vector<64x128xf32> to vector<64x128xbf16>
    %c0_6 = arith.constant 0 : index
    %c0_7 = arith.constant 0 : index
    %10 = vector.load %arg4[%c0_6, %c0_7] : memref<64x128xbf16, #tpu.memory_space<vmem>>, vector<64x128xbf16>
    tpu.vector_store %arg4[%c0_6, %c0_7], %9 {strides = array<i32>} : memref<64x128xbf16, #tpu.memory_space<vmem>>, vector<64x128xbf16>,
    return
  }
  func.func @transform_0(%arg0: i32) -> (i32, i32) {
    %c0_i32 = arith.constant 0 : i32
    %c0_i32_0 = arith.constant 0 : i32
    return %arg0, %c0_i32 : i32, i32
  }
  func.func @transform_1(%arg0: i32) -> (i32, i32) {
    %c0_i32 = arith.constant 0 : i32
    %c0_i32_0 = arith.constant 0 : i32
    %c0_i32_1 = arith.constant 0 : i32
    return %c0_i32, %c0_i32_0 : i32, i32
  }
  func.func @transform_2(%arg0: i32) -> (i32, i32) {
    %c0_i32 = arith.constant 0 : i32
    %c0_i32_0 = arith.constant 0 : i32
    %c0_i32_1 = arith.constant 0 : i32
    return %c0_i32, %c0_i32_0 : i32, i32
  }
  func.func @transform_3(%arg0: i32) -> (i32, i32) {
    %c0_i32 = arith.constant 0 : i32
    %c0_i32_0 = arith.constant 0 : i32
    return %arg0, %c0_i32 : i32, i32
  }
}

module attributes {stable_mosaic.version = 11 : i64} {
  func.func @_mm_full_bn_kernel(%arg0: i32, %arg1: memref<16x128xbf16, #tpu.memory_space<vmem>>, %arg2: memref<128x128xbf16, #tpu.memory_space<vmem>>, %arg3: memref<16x128xbf16, #tpu.memory_space<vmem>>, %arg4: memref<1x1x128xf32, #tpu.memory_space<vmem>>, %arg5: memref<1x1x128xf32, #tpu.memory_space<vmem>>) attributes {dimension_semantics = [#tpu.dimension_semantics<parallel>], iteration_bounds = array<i64: 2>, scalar_prefetch = 0 : i64, scratch_operands = 0 : i64, tpu.core_type = #tpu.core_type<tc>, window_params = [{transform_indices = @transform_0, window_bounds = array<i64: 16, 128>}, {pipeline_mode = #tpu.pipeline_mode<synchronous>, transform_indices = @transform_1, window_bounds = array<i64: 128, 128>}, {transform_indices = @transform_2, window_bounds = array<i64: 16, 128>}, {transform_indices = @transform_3, window_bounds = array<i64: 1, 1, 128>}, {transform_indices = @transform_4, window_bounds = array<i64: 1, 1, 128>}]} {
    %c0 = arith.constant 0 : index
    %c0_0 = arith.constant 0 : index
    %0 = vector.load %arg1[%c0, %c0_0] : memref<16x128xbf16, #tpu.memory_space<vmem>>, vector<16x128xbf16>
    %c0_1 = arith.constant 0 : index
    %c0_2 = arith.constant 0 : index
    %1 = vector.load %arg2[%c0_1, %c0_2] : memref<128x128xbf16, #tpu.memory_space<vmem>>, vector<128x128xbf16>
    %cst = arith.constant dense<0.000000e+00> : vector<16x128xf32>
    %2 = tpu.matmul %0, %1, %cst {dimension_numbers = #tpu.dot_dimension_numbers<[1], [0], [0], [1], [0, 0, 1, 1], [], []>} : vector<16x128xbf16>, vector<128x128xbf16>, vector<16x128xf32> -> vector<16x128xf32>
    %3 = arith.truncf %2 : vector<16x128xf32> to vector<16x128xbf16>
    %c0_3 = arith.constant 0 : index
    %c0_4 = arith.constant 0 : index
    %4 = vector.load %arg3[%c0_3, %c0_4] : memref<16x128xbf16, #tpu.memory_space<vmem>>, vector<16x128xbf16>
    tpu.vector_store %arg3[%c0_3, %c0_4], %3 {strides = array<i32>} : memref<16x128xbf16, #tpu.memory_space<vmem>>, vector<16x128xbf16>,
    %cst_5 = arith.constant dense<0.000000e+00> : vector<128xf32>
    %5 = vector.multi_reduction <add>, %2, %cst_5 [0] : vector<16x128xf32> to vector<128xf32>
    %6 = vector.shape_cast %5 : vector<128xf32> to vector<1x128xf32>
    %7 = vector.shape_cast %6 : vector<1x128xf32> to vector<1x1x128xf32>
    %c0_6 = arith.constant 0 : index
    %c0_7 = arith.constant 0 : index
    %c0_8 = arith.constant 0 : index
    %8 = vector.load %arg4[%c0_6, %c0_7, %c0_8] : memref<1x1x128xf32, #tpu.memory_space<vmem>>, vector<1x1x128xf32>
    tpu.vector_store %arg4[%c0_6, %c0_7, %c0_8], %7 {strides = array<i32>} : memref<1x1x128xf32, #tpu.memory_space<vmem>>, vector<1x1x128xf32>,
    %9 = arith.mulf %2, %2 : vector<16x128xf32>
    %cst_9 = arith.constant dense<0.000000e+00> : vector<128xf32>
    %10 = vector.multi_reduction <add>, %9, %cst_9 [0] : vector<16x128xf32> to vector<128xf32>
    %11 = vector.shape_cast %10 : vector<128xf32> to vector<1x128xf32>
    %12 = vector.shape_cast %11 : vector<1x128xf32> to vector<1x1x128xf32>
    %c0_10 = arith.constant 0 : index
    %c0_11 = arith.constant 0 : index
    %c0_12 = arith.constant 0 : index
    %13 = vector.load %arg5[%c0_10, %c0_11, %c0_12] : memref<1x1x128xf32, #tpu.memory_space<vmem>>, vector<1x1x128xf32>
    tpu.vector_store %arg5[%c0_10, %c0_11, %c0_12], %12 {strides = array<i32>} : memref<1x1x128xf32, #tpu.memory_space<vmem>>, vector<1x1x128xf32>,
    return
  }
  func.func @transform_0(%arg0: i32) -> (i32, i32) {
    %c0_i32 = arith.constant 0 : i32
    %c0_i32_0 = arith.constant 0 : i32
    return %arg0, %c0_i32 : i32, i32
  }
  func.func @transform_1(%arg0: i32) -> (i32, i32) {
    %c0_i32 = arith.constant 0 : i32
    %c0_i32_0 = arith.constant 0 : i32
    %c0_i32_1 = arith.constant 0 : i32
    return %c0_i32, %c0_i32_0 : i32, i32
  }
  func.func @transform_2(%arg0: i32) -> (i32, i32) {
    %c0_i32 = arith.constant 0 : i32
    %c0_i32_0 = arith.constant 0 : i32
    return %arg0, %c0_i32 : i32, i32
  }
  func.func @transform_3(%arg0: i32) -> (i32, i32, i32) {
    %c0_i32 = arith.constant 0 : i32
    %c0_i32_0 = arith.constant 0 : i32
    %c0_i32_1 = arith.constant 0 : i32
    return %arg0, %c0_i32, %c0_i32_0 : i32, i32, i32
  }
  func.func @transform_4(%arg0: i32) -> (i32, i32, i32) {
    %c0_i32 = arith.constant 0 : i32
    %c0_i32_0 = arith.constant 0 : i32
    %c0_i32_1 = arith.constant 0 : i32
    return %arg0, %c0_i32, %c0_i32_0 : i32, i32, i32
  }
}

module attributes {stable_mosaic.version = 11 : i64} {
  func.func @_bn_act_kernel(%arg0: i32, %arg1: i32, %arg2: memref<16x128xbf16, #tpu.memory_space<vmem>>, %arg3: memref<1x128xf32, #tpu.memory_space<vmem>>, %arg4: memref<1x128xf32, #tpu.memory_space<vmem>>, %arg5: memref<16x128xbf16, #tpu.memory_space<vmem>>) attributes {dimension_semantics = [#tpu.dimension_semantics<parallel>, #tpu.dimension_semantics<parallel>], iteration_bounds = array<i64: 2, 1>, scalar_prefetch = 0 : i64, scratch_operands = 0 : i64, tpu.core_type = #tpu.core_type<tc>, window_params = [{transform_indices = @transform_0, window_bounds = array<i64: 16, 128>}, {transform_indices = @transform_1, window_bounds = array<i64: 1, 128>}, {transform_indices = @transform_2, window_bounds = array<i64: 1, 128>}, {transform_indices = @transform_3, window_bounds = array<i64: 16, 128>}]} {
    %c0 = arith.constant 0 : index
    %c0_0 = arith.constant 0 : index
    %0 = vector.load %arg2[%c0, %c0_0] : memref<16x128xbf16, #tpu.memory_space<vmem>>, vector<16x128xbf16>
    %1 = arith.extf %0 : vector<16x128xbf16> to vector<16x128xf32>
    %c0_1 = arith.constant 0 : index
    %c0_2 = arith.constant 0 : index
    %2 = vector.load %arg3[%c0_1, %c0_2] : memref<1x128xf32, #tpu.memory_space<vmem>>, vector<1x128xf32>
    %3 = vector.broadcast %2 : vector<1x128xf32> to vector<16x128xf32>
    %4 = arith.mulf %1, %3 : vector<16x128xf32>
    %c0_3 = arith.constant 0 : index
    %c0_4 = arith.constant 0 : index
    %5 = vector.load %arg4[%c0_3, %c0_4] : memref<1x128xf32, #tpu.memory_space<vmem>>, vector<1x128xf32>
    %6 = vector.broadcast %5 : vector<1x128xf32> to vector<16x128xf32>
    %7 = arith.addf %4, %6 : vector<16x128xf32>
    %cst = arith.constant 2.000000e-01 : f32
    %8 = vector.broadcast %cst : f32 to vector<16x128xf32>
    %9 = arith.mulf %8, %7 : vector<16x128xf32>
    %10 = arith.maximumf %7, %9 : vector<16x128xf32>
    %11 = arith.truncf %10 : vector<16x128xf32> to vector<16x128xbf16>
    %c0_5 = arith.constant 0 : index
    %c0_6 = arith.constant 0 : index
    %12 = vector.load %arg5[%c0_5, %c0_6] : memref<16x128xbf16, #tpu.memory_space<vmem>>, vector<16x128xbf16>
    tpu.vector_store %arg5[%c0_5, %c0_6], %11 {strides = array<i32>} : memref<16x128xbf16, #tpu.memory_space<vmem>>, vector<16x128xbf16>,
    return
  }
  func.func @transform_0(%arg0: i32, %arg1: i32) -> (i32, i32) {
    %c0_i32 = arith.constant 0 : i32
    return %arg0, %arg1 : i32, i32
  }
  func.func @transform_1(%arg0: i32, %arg1: i32) -> (i32, i32) {
    %c0_i32 = arith.constant 0 : i32
    %c0_i32_0 = arith.constant 0 : i32
    return %c0_i32, %arg1 : i32, i32
  }
  func.func @transform_2(%arg0: i32, %arg1: i32) -> (i32, i32) {
    %c0_i32 = arith.constant 0 : i32
    %c0_i32_0 = arith.constant 0 : i32
    return %c0_i32, %arg1 : i32, i32
  }
  func.func @transform_3(%arg0: i32, %arg1: i32) -> (i32, i32) {
    %c0_i32 = arith.constant 0 : i32
    return %arg0, %arg1 : i32, i32
  }
}

module attributes {stable_mosaic.version = 11 : i64} {
  func.func @_mm_full_bias_act_kernel(%arg0: i32, %arg1: memref<16x256xbf16, #tpu.memory_space<vmem>>, %arg2: memref<256x128xbf16, #tpu.memory_space<vmem>>, %arg3: memref<1x128xf32, #tpu.memory_space<vmem>>, %arg4: memref<16x128xf32, #tpu.memory_space<vmem>>) attributes {dimension_semantics = [#tpu.dimension_semantics<parallel>], iteration_bounds = array<i64: 1>, scalar_prefetch = 0 : i64, scratch_operands = 0 : i64, tpu.core_type = #tpu.core_type<tc>, window_params = [{transform_indices = @transform_0, window_bounds = array<i64: 16, 256>}, {pipeline_mode = #tpu.pipeline_mode<synchronous>, transform_indices = @transform_1, window_bounds = array<i64: 256, 128>}, {pipeline_mode = #tpu.pipeline_mode<synchronous>, transform_indices = @transform_2, window_bounds = array<i64: 1, 128>}, {transform_indices = @transform_3, window_bounds = array<i64: 16, 128>}]} {
    %c0 = arith.constant 0 : index
    %c0_0 = arith.constant 0 : index
    %0 = vector.load %arg1[%c0, %c0_0] : memref<16x256xbf16, #tpu.memory_space<vmem>>, vector<16x256xbf16>
    %c0_1 = arith.constant 0 : index
    %c0_2 = arith.constant 0 : index
    %1 = vector.load %arg2[%c0_1, %c0_2] : memref<256x128xbf16, #tpu.memory_space<vmem>>, vector<256x128xbf16>
    %cst = arith.constant dense<0.000000e+00> : vector<16x128xf32>
    %2 = tpu.matmul %0, %1, %cst {dimension_numbers = #tpu.dot_dimension_numbers<[1], [0], [0], [1], [0, 0, 1, 1], [], []>} : vector<16x256xbf16>, vector<256x128xbf16>, vector<16x128xf32> -> vector<16x128xf32>
    %c0_3 = arith.constant 0 : index
    %c0_4 = arith.constant 0 : index
    %3 = vector.load %arg3[%c0_3, %c0_4] : memref<1x128xf32, #tpu.memory_space<vmem>>, vector<1x128xf32>
    %4 = vector.broadcast %3 : vector<1x128xf32> to vector<16x128xf32>
    %5 = arith.addf %2, %4 : vector<16x128xf32>
    %cst_5 = arith.constant 0.000000e+00 : f32
    %6 = vector.broadcast %cst_5 : f32 to vector<16x128xf32>
    %7 = arith.subf %6, %5 : vector<16x128xf32>
    %8 = math.exp %7 : vector<16x128xf32>
    %cst_6 = arith.constant 1.000000e+00 : f32
    %9 = vector.broadcast %cst_6 : f32 to vector<16x128xf32>
    %10 = arith.addf %9, %8 : vector<16x128xf32>
    %11 = tpu.reciprocal %10 {approx = true} : vector<16x128xf32> -> vector<16x128xf32>
    %cst_7 = arith.constant 0.000000e+00 : f32
    %cst_8 = arith.constant 1.000000e+00 : f32
    %12 = vector.broadcast %cst_7 : f32 to vector<16x128xf32>
    %13 = arith.maximumf %12, %11 : vector<16x128xf32>
    %14 = vector.broadcast %cst_8 : f32 to vector<16x128xf32>
    %15 = arith.minimumf %14, %13 : vector<16x128xf32>
    %c0_9 = arith.constant 0 : index
    %c0_10 = arith.constant 0 : index
    %16 = vector.load %arg4[%c0_9, %c0_10] : memref<16x128xf32, #tpu.memory_space<vmem>>, vector<16x128xf32>
    tpu.vector_store %arg4[%c0_9, %c0_10], %15 {strides = array<i32>} : memref<16x128xf32, #tpu.memory_space<vmem>>, vector<16x128xf32>,
    return
  }
  func.func @transform_0(%arg0: i32) -> (i32, i32) {
    %c0_i32 = arith.constant 0 : i32
    %c0_i32_0 = arith.constant 0 : i32
    return %arg0, %c0_i32 : i32, i32
  }
  func.func @transform_1(%arg0: i32) -> (i32, i32) {
    %c0_i32 = arith.constant 0 : i32
    %c0_i32_0 = arith.constant 0 : i32
    %c0_i32_1 = arith.constant 0 : i32
    return %c0_i32, %c0_i32_0 : i32, i32
  }
  func.func @transform_2(%arg0: i32) -> (i32, i32) {
    %c0_i32 = arith.constant 0 : i32
    %c0_i32_0 = arith.constant 0 : i32
    %c0_i32_1 = arith.constant 0 : i32
    return %c0_i32, %c0_i32_0 : i32, i32
  }
  func.func @transform_3(%arg0: i32) -> (i32, i32) {
    %c0_i32 = arith.constant 0 : i32
    %c0_i32_0 = arith.constant 0 : i32
    return %arg0, %c0_i32 : i32, i32
  }
}

</mosaic_0001>

<bundles_post_ra>
// kernel: _forward.4
= control target key start
LH: loop header
LB: loop body
LE: loop exit
PB: predicated region body
PF: predicated region fallthrough
CT: control target
= control target key end

     0   :  { %s618_s12 = smov 0   ;;  %s675_s0 = inlined_call_operand.vmem [shape: bf16[128,128], index: 0, kind: input, shape index: {}]   ;;  %s676_s1 = inlined_call_operand.vmem [shape: bf16[128,128], index: 1, kind: input, shape index: {}]   ;;  %s677_s2 = inlined_call_operand.vmem [shape: f32[1,128], index: 2, kind: input, shape index: {}]   ;;  %s678_s3 = inlined_call_operand.vmem [shape: bf16[128,128], index: 3, kind: output, shape index: {}]  }
   0x1 LB: > { %s455_s13 = sadd.s32 4294967295, %s596_s12   ;;  %p459_p0 = scmp.ge.s32.totalorder %s596_s12, 1  ;;  %s596_s12 = sphi %s618_s12, %s13_s12  }
   0x2   : > { %p138_p1 = scmp.lt.s32.totalorder %s596_s12, 3 }
   0x4   : > { %p139_p2 = pnand %p459_p0, %p138_p1 }
   0x5   : > { %s460_s16 = sshll.u32 (!%p139_p2), %s455_s13, 3 }
   0x6   : > { %142 = sbr.rel (%p139_p2) target bundleno = 252 (0xfc), region = 32  ;;  %p163_p3 = scmp.lt.s32.totalorder (!%p139_p2), %s460_s16, 15 }
   0xb   : > { %v578_v0 = vld [vmem:[%s676_s1 + $0x38] sm:$0xff]   ;;  %v579_v1 = vld [vmem:[%s676_s1 + $0x30] sm:$0xff]   ;;  %s680_s16 = smov (!%p163_p3, %s460_s16), 15  ;;  %v580_v2 = vld [vmem:[%s676_s1 + $0x28] sm:$0xff]  }
   0xc   : > { %530 = vmatprep.subr.bf16.mxu0 %v578_v0  ;;  %554 = vmatprep.subr.bf16.mxu1 %v578_v0  ;;  %s461_s21 = sshll.u32 %s680_s16, 2  ;;  %v581_v3 = vld [vmem:[%s676_s1 + $0x20] sm:$0xff]   ;;  %v582_v6 = vld [vmem:[%s676_s1 + $0x18] sm:$0xff]   ;;  %v583_v7 = vld [vmem:[%s676_s1 + $0x10] sm:$0xff]  }
   0xd   : > { %531 = vmatpush3.bf16.msra.mxu0 %v578_v0  ;;  %562 = vmatpush3.bf16.msra.mxu1 %v578_v0  ;;  %s643_s24 = scalar_lea.vmem %s675_s0, %s461_s21  ;;  %v584_v8 = vld [vmem:[%s676_s1 + $0x8] sm:$0xff]   ;;  %v585_v9 = vld [vmem:[%s676_s1] sm:$0xff]   ;;  %s172_s13 = scalar_lea.vmem %s678_s3, %s461_s21 }
   0xe   : > { %532 = vmatprep.subr.bf16.mxu0 %v579_v1  ;;  %555 = vmatprep.subr.bf16.mxu1 %v579_v1  ;;  %v586_v4 = vld [vmem:[%s643_s24] sm:$0xff]   ;;  %v587_v5 = vld [vmem:[%s643_s24 + $0x10] sm:$0xff]   ;;  %v588_v10 = vld [vmem:[%s643_s24 + $0x8] sm:$0xff]  }
   0xf   : > { %546 = vmatprep.mubr.bf16.mxu0 %v586_v4  ;;  %550 = vmatprep.mubr.bf16.mxu1 %v587_v5  ;;  %v589_v11 = vld [vmem:[%s643_s24 + $0x18] sm:$0xff]   ;;  %v464_v12 = vld [vmem:[%s677_s2] ss:$0 sm:$0xff] }
  0x11   : > { %533 = vmatpush3.bf16.msra.mxu0 %v579_v1  ;;  %563 = vmatpush3.bf16.msra.mxu1 %v579_v1 }
  0x12   : > { %534 = vmatprep.subr.bf16.mxu0 %v580_v2  ;;  %556 = vmatprep.subr.bf16.mxu1 %v580_v2 }
  0x15   : > { %535 = vmatpush3.bf16.msra.mxu0 %v580_v2  ;;  %564 = vmatpush3.bf16.msra.mxu1 %v580_v2 }
  0x16   : > { %536 = vmatprep.subr.bf16.mxu0 %v581_v3  ;;  %557 = vmatprep.subr.bf16.mxu1 %v581_v3 }
  0x19   : > { %537 = vmatpush3.bf16.msra.mxu0 %v581_v3  ;;  %565 = vmatpush3.bf16.msra.mxu1 %v581_v3 }
  0x1a   : > { %538 = vmatprep.subr.bf16.mxu0 %v582_v6  ;;  %558 = vmatprep.subr.bf16.mxu1 %v582_v6 }
  0x1d   : > { %539 = vmatpush3.bf16.msra.mxu0 %v582_v6  ;;  %566 = vmatpush3.bf16.msra.mxu1 %v582_v6 }
  0x1e   : > { %540 = vmatprep.subr.bf16.mxu0 %v583_v7  ;;  %559 = vmatprep.subr.bf16.mxu1 %v583_v7 }
  0x21   : > { %541 = vmatpush3.bf16.msra.mxu0 %v583_v7  ;;  %567 = vmatpush3.bf16.msra.mxu1 %v583_v7 }
  0x22   : > { %542 = vmatprep.subr.bf16.mxu0 %v584_v8  ;;  %560 = vmatprep.subr.bf16.mxu1 %v584_v8 }
  0x25   : > { %543 = vmatpush3.bf16.msra.mxu0 %v584_v8  ;;  %568 = vmatpush3.bf16.msra.mxu1 %v584_v8 }
  0x26   : > { %544 = vmatprep.subr.bf16.mxu0 %v585_v9  ;;  %561 = vmatprep.subr.bf16.mxu1 %v585_v9 }
  0x29   : > { %545 = vmatpush3.bf16.msra.mxu0 %v585_v9  ;;  %569 = vmatpush3.bf16.msra.mxu1 %v585_v9 }
  0x2c   : > { %547 = vmatmul.mubr.bf16.vlgmr.msra.gmra.mxu0 %v588_v10  ;;  %551 = vmatmul.mubr.bf16.vlgmr.msra.gmra.mxu1 %v589_v11 }
  0xec   : > { %v548_v13 = vpop.f32.mrf.mxu0  ;;  %v552_v14 = vpop.f32.mrf.mxu1 }
  0xed   : > { %v321_v15 = vadd.f32 %v548_v13, %v464_v12  ;;  %v337_v16 = vadd.f32 %v552_v14, %v464_v12 }
  0xee   : > { %v312_v17 = vpop.f32.mrf.mxu0  ;;  %v328_v18 = vpop.f32.mrf.mxu1 }
  0xef   : > { %v313_v19 = vadd.f32 %v464_v12, %v312_v17  ;;  %v329_v20 = vadd.f32 %v464_v12, %v328_v18  ;;  %v345_v23 = vmul.f32 0.2, %v321_v15  ;;  %v349_v24 = vmul.f32 0.2, %v337_v16 }
  0xf0   : > { %v549_v21 = vpop.f32.mrf.mxu0  ;;  %v553_v22 = vpop.f32.mrf.mxu1 }
  0xf1   : > { %v324_v25 = vadd.f32 %v549_v21, %v464_v12  ;;  %v340_v26 = vadd.f32 %v553_v22, %v464_v12  ;;  %v343_v29 = vmul.f32 0.2, %v313_v19  ;;  %v347_v30 = vmul.f32 0.2, %v329_v20 }
  0xf2   : > { %v315_v27 = vpop.f32.mrf.mxu0  ;;  %v331_v28 = vpop.f32.mrf.mxu1  ;;  %v353_v37 = vmax.f32 %v321_v15, %v345_v23  ;;  %v357_v38 = vmax.f32 %v337_v16, %v349_v24 }
  0xf3   : > { %v316_v31 = vadd.f32 %v464_v12, %v315_v27  ;;  %v332_v32 = vadd.f32 %v464_v12, %v331_v28  ;;  %v346_v33 = vmul.f32 0.2, %v324_v25  ;;  %v350_v34 = vmul.f32 0.2, %v340_v26 }
  0xf4   : > { %v351_v41 = vmax.f32 %v313_v19, %v343_v29  ;;  %v355_v42 = vmax.f32 %v329_v20, %v347_v30 }
  0xf5   : > { %v344_v35 = vmul.f32 0.2, %v316_v31  ;;  %v348_v36 = vmul.f32 0.2, %v332_v32  ;;  %v354_v39 = vmax.f32 %v324_v25, %v346_v33  ;;  %v358_v40 = vmax.f32 %v340_v26, %v350_v34 }
  0xf7   : > { %v352_v43 = vmax.f32 %v316_v31, %v344_v35  ;;  %v356_v44 = vmax.f32 %v332_v32, %v348_v36  ;;  %v503_v45 = vpack.c.bf16 %v354_v39, %v353_v37  ;;  %v513_v46 = vpack.c.bf16 %v358_v40, %v357_v38 }
  0xf9   : > { %v498_v47 = vpack.c.bf16 %v352_v43, %v351_v41  ;;  %v508_v48 = vpack.c.bf16 %v356_v44, %v355_v42  ;;  %515 = vst [vmem:[%s172_s13 + $0x8] sm:$0xff] %v503_v45   ;;  %517 = vst [vmem:[%s172_s13 + $0x18] sm:$0xff] %v513_v46  }
  0xfb   : > { %499 = vst [vmem:[%s172_s13] sm:$0xff] %v498_v47   ;;  %516 = vst [vmem:[%s172_s13 + $0x10] sm:$0xff] %v508_v48  }
  0xfc PF: > { %s13_s12 = sadd.s32 1, %s596_s12  }
  0xfd   : > { %p10_p4 = scmp.ge.s32.totalorder %s13_s12, 4  }
  0xff   :  { %12 = sbr.rel (!%p10_p4) target bundleno = 1 (0x1), region = 62 }

// kernel: _forward.5
= control target key start
LH: loop header
LB: loop body
LE: loop exit
PB: predicated region body
PF: predicated region fallthrough
CT: control target
= control target key end

     0   :  { %s578_s15 = smov 0   ;;  %s630_s0 = inlined_call_operand.vmem [shape: bf16[32,128], index: 0, kind: input, shape index: {}]   ;;  %s631_s1 = inlined_call_operand.vmem [shape: bf16[128,128], index: 1, kind: input, shape index: {}]   ;;  %s632_s2 = inlined_call_operand.vmem [shape: bf16[32,128], index: 2, kind: output, shape index: {0}]   ;;  %s633_s3 = inlined_call_operand.vmem [shape: f32[2,1,128], index: 3, kind: output, shape index: {1}]   ;;  %s634_s4 = inlined_call_operand.vmem [shape: f32[2,1,128], index: 4, kind: output, shape index: {2}]  }
   0x1 LB: > { %s584_s16 = sadd.s32 4294967295, %s549_s15   ;;  %p470_p0 = scmp.ge.s32.totalorder %s549_s15, 1  ;;  %s549_s15 = sphi %s578_s15, %s15_s15  }
   0x2   : > { %p168_p1 = scmp.lt.s32.totalorder %s549_s15, 3 }
   0x4   : > { %p169_p2 = pnand %p470_p0, %p168_p1 }
   0x5   : > { %s471_s21 = sshll.u32 (!%p169_p2), %s584_s16, 1  ;;  %p212_p4 = scmp.lt.s32.totalorder (!%p169_p2), %s584_s16, 1 }
   0x6   : > { %172 = sbr.rel (%p169_p2) target bundleno = 258 (0x102), region = 28  ;;  %p201_p3 = scmp.lt.s32.totalorder (!%p169_p2), %s471_s21, 3 }
   0xb   : > { %v534_v0 = vld [vmem:[%s631_s1 + $0x38] sm:$0xff]   ;;  %v551_v1 = vmov 0.0   ;;  %v535_v2 = vld [vmem:[%s631_s1 + $0x30] sm:$0xff]   ;;  %vm552_vm0 = vmmov 0   ;;  %s636_s21 = smov (!%p201_p3, %s471_s21), 3  ;;  %v536_v3 = vld [vmem:[%s631_s1 + $0x28] sm:$0xff]  }
   0xc   : > { %504 = vmatprep.subr.bf16.mxu0 %v551_v1  ;;  %520 = vmatprep.mubr.msk.bf16.mxu0 %vm552_vm0, %v551_v1  ;;  %s472_s24 = sshll.u32 %s636_s21, 2  ;;  %v537_v4 = vld [vmem:[%s631_s1 + $0x20] sm:$0xff]   ;;  %v538_v5 = vld [vmem:[%s631_s1 + $0x18] sm:$0xff]   ;;  %v539_v6 = vld [vmem:[%s631_s1 + $0x10] sm:$0xff]   ;;  %s638_s16 = smov (!%p212_p4, %s584_s16), 1 }
   0xd   : > { %505 = vmatpush3.bf16.msra.mxu0 %v534_v0  ;;  %s204_s27 = scalar_lea.vmem %s630_s0, %s472_s24  ;;  %v540_v7 = vld [vmem:[%s631_s1 + $0x8] sm:$0xff]   ;;  %v541_v8 = vld [vmem:[%s631_s1] sm:$0xff]   ;;  %s210_s14 = scalar_lea.vmem %s632_s2, %s472_s24 }
   0xe   : > { %506 = vmatprep.subr.bf16.mxu0 %v551_v1  ;;  %v542_v9 = vld [vmem:[%s204_s27] sm:$0xff]   ;;  %s214_s19 = scalar_lea.vmem %s633_s3, %s638_s16  ;;  %s217_s22 = scalar_lea.vmem %s634_s4, %s638_s16 }
  0x11   : > { %507 = vmatpush3.bf16.msra.mxu0 %v535_v2 }
  0x12   : > { %508 = vmatprep.subr.bf16.mxu0 %v551_v1 }
  0x15   : > { %509 = vmatpush3.bf16.msra.mxu0 %v536_v3 }
  0x16   : > { %510 = vmatprep.subr.bf16.mxu0 %v551_v1 }
  0x19   : > { %511 = vmatpush3.bf16.msra.mxu0 %v537_v4 }
  0x1a   : > { %512 = vmatprep.subr.bf16.mxu0 %v551_v1 }
  0x1d   : > { %513 = vmatpush3.bf16.msra.mxu0 %v538_v5 }
  0x1e   : > { %514 = vmatprep.subr.bf16.mxu0 %v551_v1 }
  0x21   : > { %515 = vmatpush3.bf16.msra.mxu0 %v539_v6 }
  0x22   : > { %516 = vmatprep.subr.bf16.mxu0 %v551_v1 }
  0x25   : > { %517 = vmatpush3.bf16.msra.mxu0 %v540_v7 }
  0x26   : > { %518 = vmatprep.subr.bf16.mxu0 %v551_v1 }
  0x29   : > { %519 = vmatpush3.bf16.msra.mxu0 %v541_v8 }
  0x2c   : > { %521 = vmatmul.mubr.bf16.vlgmr.msra.gmra.mxu0 %v542_v9 }
  0xec   : > { %v325_v10 = vpop.f32.mrf.mxu0 }
  0xed   : > { %v350_v13 = vmul.f32 %v325_v10, %v325_v10 }
  0xee   : > { %v522_v11 = vpop.f32.mrf.mxu0 }
  0xf0   : > { %v328_v12 = vpop.f32.mrf.mxu0 }
  0xf1   : > { %v493_v14 = vpack.c.bf16 %v328_v12, %v325_v10  ;;  %v342_v15 = vadd.f32 %v328_v12, %v325_v10  ;;  %v351_v16 = vmul.f32 %v328_v12, %v328_v12 }
  0xf2   : > { %v523_v17 = vpop.f32.mrf.mxu0 }
  0xf3   : > { %494 = vst [vmem:[%s210_s14] sm:$0xff] %v493_v14   ;;  %v343_v18 = vrot.slane %v342_v15, 4  ;;  %v352_v19 = vadd.f32 %v351_v16, %v350_v13 }
  0xf5   : > { %v344_v20 = vadd.f32 %v343_v18, %v342_v15  ;;  %v353_v21 = vrot.slane %v352_v19, 4 }
  0xf7   : > { %v345_v22 = vrot.slane %v344_v20, 2  ;;  %v354_v23 = vadd.f32 %v353_v21, %v352_v19 }
  0xf9   : > { %v346_v24 = vadd.f32 %v345_v22, %v344_v20  ;;  %v355_v25 = vrot.slane %v354_v23, 2 }
  0xfb   : > { %v347_v26 = vrot.slane %v346_v24, 1  ;;  %v356_v27 = vadd.f32 %v355_v25, %v354_v23 }
  0xfd   : > { %v348_v28 = vadd.f32 %v347_v26, %v346_v24  ;;  %v357_v29 = vrot.slane %v356_v27, 1 }
  0xff   : > { %349 = vst [vmem:[%s214_s19] sm:$0x1] %v348_v28  ;;  %v358_v30 = vadd.f32 %v357_v29, %v356_v27 }
 0x101   : > { %359 = vst [vmem:[%s217_s22] sm:$0x1] %v358_v30 }
 0x102 PF: > { %s15_s15 = sadd.s32 1, %s549_s15  }
 0x103   : > { %p12_p5 = scmp.ge.s32.totalorder %s15_s15, 4  }
 0x105   :  { %14 = sbr.rel (!%p12_p5) target bundleno = 1 (0x1), region = 82 }

// kernel: _forward.6
= control target key start
LH: loop header
LB: loop body
LE: loop exit
PB: predicated region body
PF: predicated region fallthrough
CT: control target
= control target key end

     0   :  { %s467_s12 = smov 0   ;;  %s469_s13 = smov 0   ;;  %s503_s0 = inlined_call_operand.vmem [shape: bf16[32,128], index: 0, kind: input, shape index: {}]   ;;  %s504_s1 = inlined_call_operand.vmem [shape: f32[1,128], index: 1, kind: input, shape index: {}]   ;;  %s505_s2 = inlined_call_operand.vmem [shape: f32[1,128], index: 2, kind: input, shape index: {}]   ;;  %s506_s3 = inlined_call_operand.vmem [shape: bf16[32,128], index: 3, kind: output, shape index: {}]  }
   0x1   :  { %s471_s14 = smov 0  }
   0x2 LB: > { %s25_s15 = sadd.s32 1, %s441_s13  ;;  %p377_p0 = scmp.ge.s32.totalorder %s445_s14, 1  ;;  %s445_s14 = sphi %s471_s14, %s13_s14   ;;  %s441_s13 = sphi %s469_s13, %s508_s13   ;;  %s437_s12 = sphi %s467_s12, %s507_s12  }
   0x3   : > { %p27_p1 = scmp.ge.s32.totalorder %s25_s15, 2  ;;  %p173_p2 = scmp.lt.s32.totalorder %s445_s14, 3 }
   0x5   : > { %s510_s15 = smov (%p27_p1, %s25_s15), 0  ;;  %p174_p3 = pnand %p377_p0, %p173_p2 }
   0x6   : > { %s378_s16 = sshll.u32 (!%p174_p3), %s437_s12, 1 }
   0x7   : > { %177 = sbr.rel (%p174_p3) target bundleno = 29 (0x1d), region = 32  ;;  %p210_p4 = scmp.lt.s32.totalorder (!%p174_p3), %s378_s16, 3 }
   0xc   : > { %s512_s16 = smov (!%p210_p4, %s378_s16), 3  ;;  %v382_v1 = vld [vmem:[%s504_s1] ss:$0 sm:$0xff] }
   0xd   : > { %s379_s17 = sshll.u32 %s512_s16, 2  ;;  %v383_v4 = vld [vmem:[%s505_s2] ss:$0 sm:$0xff] }
   0xe   : > { %s216_s20 = scalar_lea.vmem %s503_s0, %s379_s17  ;;  %s231_s27 = scalar_lea.vmem %s506_s3, %s379_s17 }
   0xf   : > { %v391_v0 = vld [vmem:[%s216_s20] sm:$0xff]  }
  0x10   : > { %v392_v2 = vunpack.c.l.bf16 %v391_v0  ;;  %v393_v3 = vunpack.c.h.bf16 %v391_v0 }
  0x12   : > { %v244_v5 = vmul.f32 %v392_v2, %v382_v1  ;;  %v245_v6 = vmul.f32 %v393_v3, %v382_v1 }
  0x14   : > { %v253_v7 = vadd.f32 %v383_v4, %v244_v5  ;;  %v254_v8 = vadd.f32 %v383_v4, %v245_v6 }
  0x16   : > { %v255_v9 = vmul.f32 0.2, %v253_v7  ;;  %v256_v10 = vmul.f32 0.2, %v254_v8 }
  0x18   : > { %v257_v11 = vmax.f32 %v253_v7, %v255_v9  ;;  %v258_v12 = vmax.f32 %v254_v8, %v256_v10 }
  0x1a   : > { %v397_v13 = vpack.c.bf16 %v258_v12, %v257_v11 }
  0x1c   : > { %398 = vst [vmem:[%s231_s27] sm:$0xff] %v397_v13  }
  0x1d PF: > { %s13_s14 = sadd.s32 1, %s445_s14   ;;  %s507_s12 = smov %s441_s13 }
  0x1e   : > { %p10_p5 = scmp.ge.s32.totalorder %s13_s14, 4   ;;  %s508_s13 = smov %s510_s15 }
  0x20   :  { %12 = sbr.rel (!%p10_p5) target bundleno = 2 (0x2), region = 68 }

// kernel: _forward.7
= control target key start
LH: loop header
LB: loop body
LE: loop exit
PB: predicated region body
PF: predicated region fallthrough
CT: control target
= control target key end

     0   :  { %s374_s1 = inlined_call_operand.vmem [shape: bf16[256,128], index: 1, kind: input, shape index: {}]   ;;  %s375_s0 = inlined_call_operand.vmem [shape: bf16[16,256], index: 0, kind: input, shape index: {}]   ;;  %s376_s2 = inlined_call_operand.vmem [shape: f32[1,128], index: 2, kind: input, shape index: {}]   ;;  %s377_s3 = inlined_call_operand.vmem [shape: f32[16,128], index: 3, kind: output, shape index: {}]  }
   0x1   :  { %v264_v0 = vld [vmem:[%s374_s1 + $0x78] sm:$0xff]   ;;  %v266_v2 = vld [vmem:[%s374_s1 + $0x70] sm:$0xff]   ;;  %v268_v4 = vld [vmem:[%s374_s1 + $0x68] sm:$0xff]  }
   0x2   :  { %v265_v1 = vld [vmem:[%s374_s1 + $0x38] sm:$0xff]   ;;  %242 = vmatprep.subr.bf16.mxu0 %v264_v0  ;;  %v267_v3 = vld [vmem:[%s374_s1 + $0x30] sm:$0xff]   ;;  %v269_v5 = vld [vmem:[%s374_s1 + $0x28] sm:$0xff]  }
   0x3   :  { %243 = vmatpush3.bf16.msra.mxu0 %v265_v1  ;;  %v270_v6 = vld [vmem:[%s374_s1 + $0x60] sm:$0xff]   ;;  %v272_v8 = vld [vmem:[%s374_s1 + $0x58] sm:$0xff]   ;;  %v274_v10 = vld [vmem:[%s374_s1 + $0x50] sm:$0xff]  }
   0x4   :  { %244 = vmatprep.subr.bf16.mxu0 %v266_v2  ;;  %v271_v7 = vld [vmem:[%s374_s1 + $0x20] sm:$0xff]   ;;  %v273_v9 = vld [vmem:[%s374_s1 + $0x18] sm:$0xff]   ;;  %v275_v12 = vld [vmem:[%s374_s1 + $0x10] sm:$0xff]  }
   0x5   :  { %v282_v11 = vld [vmem:[%s375_s0 + $0x4] ss:$8 sps:$4 sm:$0xff]   ;;  %v280_v17 = vld [vmem:[%s375_s0] ss:$8 sps:$4 sm:$0xff]  }
   0x6   :  { %194 = vmatprep.mubr.bf16.mxu0 %v282_v11  ;;  %v276_v13 = vld [vmem:[%s374_s1 + $0x48] sm:$0xff]   ;;  %v278_v15 = vld [vmem:[%s374_s1 + $0x40] sm:$0xff]  }
   0x7   :  { %245 = vmatpush3.bf16.msra.mxu0 %v267_v3  ;;  %v277_v14 = vld [vmem:[%s374_s1 + $0x8] sm:$0xff]   ;;  %v279_v16 = vld [vmem:[%s374_s1] sm:$0xff]  }
   0x8   :  { %246 = vmatprep.subr.bf16.mxu0 %v268_v4  ;;  %v223_v19 = vld [vmem:[%s376_s2] ss:$0 sm:$0xff] }
   0xb   :  { %247 = vmatpush3.bf16.msra.mxu0 %v269_v5 }
   0xc   :  { %248 = vmatprep.subr.bf16.mxu0 %v270_v6 }
   0xf   :  { %249 = vmatpush3.bf16.msra.mxu0 %v271_v7 }
  0x10   :  { %250 = vmatprep.subr.bf16.mxu0 %v272_v8 }
  0x13   :  { %251 = vmatpush3.bf16.msra.mxu0 %v273_v9 }
  0x14   :  { %252 = vmatprep.subr.bf16.mxu0 %v274_v10 }
  0x17   :  { %253 = vmatpush3.bf16.msra.mxu0 %v275_v12 }
  0x18   :  { %254 = vmatprep.subr.bf16.mxu0 %v276_v13 }
  0x1b   :  { %255 = vmatpush3.bf16.msra.mxu0 %v277_v14 }
  0x1c   :  { %256 = vmatprep.subr.bf16.mxu0 %v278_v15 }
  0x1f   :  { %257 = vmatpush3.bf16.msra.mxu0 %v279_v16 }
  0x22   :  { %195 = vmatmul.mubr.bf16.vlgmr.msra.gmra.mxu0 %v280_v17 }
  0xe2   :  { %v258_v18 = vpop.f32.mrf.mxu0 }
  0xe4   :  { %v259_v20 = vpop.f32.mrf.mxu0 }
  0xe5   :  { %v260_v21 = vadd.f32 %v259_v20, %v258_v18 }
  0xe6   :  { %v261_v22 = vpop.f32.mrf.mxu0 }
  0xe7   :  { %v197_v23 = vadd.f32 %v260_v21, %v223_v19 }
  0xe8   :  { %v262_v24 = vpop.f32.mrf.mxu0 }
  0xe9   :  { %v203_v25 = vsub.f32 0.0, %v197_v23  ;;  %v263_v26 = vadd.f32 %v262_v24, %v261_v22 }
  0xeb   :  { %v205_v27 = vmul.f32 1.442695, %v203_v25  ;;  %v200_v28 = vadd.f32 %v263_v26, %v223_v19 }
  0xed   :  { %283 = vpow2.f32 %v205_v27  ;;  %v204_v29 = vsub.f32 0.0, %v200_v28 }
  0xef   :  { %v207_v30 = vmul.f32 1.442695, %v204_v29 }
  0xf1   :  { %285 = vpow2.f32 %v207_v30 }
  0xfa   :  { %v284_v31 = vpop.eup %283 }
  0xfb   :  { %v209_v32 = vadd.f32 1.0, %v284_v31 }
  0xfd   :  { %287 = vrcp.f32 %v209_v32 }
  0xfe   :  { %v286_v33 = vpop.eup %285 }
  0xff   :  { %v210_v34 = vadd.f32 1.0, %v286_v33 }
 0x101   :  { %289 = vrcp.f32 %v210_v34 }
 0x10a   :  { %v288_v35 = vpop.eup %287 }
 0x10b   :  { %v213_v36 = vmax.f32 %v288_v35, 0.0 }
 0x10d   :  { %v215_v37 = vmin.f32 %v213_v36, 1.0 }
 0x10e   :  { %v290_v38 = vpop.eup %289 }
 0x10f   :  { %217 = vst [vmem:[%s377_s3] sm:$0xff] %v215_v37  ;;  %v214_v39 = vmax.f32 %v290_v38, 0.0 }
 0x111   :  { %v216_v40 = vmin.f32 %v214_v39, 1.0 }
 0x113   :  { %218 = vst [vmem:[%s377_s3 + $0x8] sm:$0xff] %v216_v40 }

</bundles_post_ra>
